<compile_context>
chip_gen: v6e
topology: v6e:2x2x1
jax: 0.10.0
libtpu: 0.0.40
codegen_flags: <defaults>
</compile_context>

<pallas_src>
import jax
import jax.numpy as jnp
from jax.experimental import pallas as pl
from jax.experimental.pallas import tpu as pltpu


# Byte alignment of the temporal offset at which the direct HBM->HBM DMA path
# stays on the fast (tile-aligned) route.  512 B = one (1, 128) lane row of
# 32-bit words in the tiled HBM layout.
_FAST_DMA_OFFSET_ALIGN_BYTES = 512
# VMEM budget for the staged path (conservative for v5e's 16 MiB scoped VMEM).
_STAGED_VMEM_BUDGET_BYTES = 16 * 1024 * 1024


def _chunk_bounds(total: int, num_chunks: int):
    """Split `total` rows into static (start, size) chunks (Python ints)."""
    num_chunks = max(1, min(num_chunks, total))
    base, rem = divmod(total, num_chunks)
    bounds, start = [], 0
    for i in range(num_chunks):
        size = base + (1 if i < rem else 0)
        bounds.append((start, size))
        start += size
    return bounds


def _skip_dma_2d(x2d: jax.Array, steps: int, t_out: int, max_dmas: int) -> jax.Array:
    """(R, T) -> (R, T_out) HBM->HBM slice copy with K concurrent DMAs."""
    rows, _ = x2d.shape
    bounds = _chunk_bounds(rows, max_dmas)
    num_dmas = len(bounds)
    itemsize = jnp.dtype(x2d.dtype).itemsize

    def kernel(x_hbm, o_hbm, sems):
        copies = []
        for i, (r0, rs) in enumerate(bounds):     # all static Python ints
            cp = pltpu.make_async_copy(
                x_hbm.at[pl.ds(r0, rs), pl.ds(steps, t_out)],
                o_hbm.at[pl.ds(r0, rs), :],
                sems.at[i],
            )
            cp.start()
            copies.append(cp)
        for cp in copies:                         # wait only after all started
            cp.wait()

    return pl.pallas_call(
        kernel,
        out_shape=jax.ShapeDtypeStruct((rows, t_out), x2d.dtype),
        in_specs=[pl.BlockSpec(memory_space=pl.ANY)],   # raw HBM ref, no auto-DMA
        out_specs=pl.BlockSpec(memory_space=pl.ANY),
        scratch_shapes=[pltpu.SemaphoreType.DMA((num_dmas,))],
        cost_estimate=pl.CostEstimate(
            flops=0, transcendentals=0,
            bytes_accessed=2 * rows * t_out * itemsize),
    )(x2d)


def _skip_dma_3d(x: jax.Array, steps: int, t_out: int, max_dmas: int) -> jax.Array:
    """(N, C, T) -> (N, C, T_out) HBM->HBM slice copy, chunked over N."""
    n, c, _ = x.shape
    bounds = _chunk_bounds(n, max_dmas)
    num_dmas = len(bounds)
    itemsize = jnp.dtype(x.dtype).itemsize

    def kernel(x_hbm, o_hbm, sems):
        copies = []
        for i, (n0, ns) in enumerate(bounds):
            cp = pltpu.make_async_copy(
                x_hbm.at[pl.ds(n0, ns), :, pl.ds(steps, t_out)],
                o_hbm.at[pl.ds(n0, ns), :, :],
                sems.at[i],
            )
            cp.start()
            copies.append(cp)
        for cp in copies:
            cp.wait()

    return pl.pallas_call(
        kernel,
        out_shape=jax.ShapeDtypeStruct((n, c, t_out), x.dtype),
        in_specs=[pl.BlockSpec(memory_space=pl.ANY)],
        out_specs=pl.BlockSpec(memory_space=pl.ANY),
        scratch_shapes=[pltpu.SemaphoreType.DMA((num_dmas,))],
        cost_estimate=pl.CostEstimate(
            flops=0, transcendentals=0,
            bytes_accessed=2 * n * c * t_out * itemsize),
    )(x)


def _skip_staged(x: jax.Array, steps: int, t_out: int) -> jax.Array:
    """VMEM-staged path for lane-misaligned offsets: load (1,C,T), shift, store."""
    n, c, t = x.shape
    itemsize = jnp.dtype(x.dtype).itemsize

    def kernel(x_ref, o_ref):
        # Static slice of the loaded block; the shift happens in-register, and
        # the store is full-width on the output block (lane-dense out_spec).
        o_ref[...] = x_ref[...][:, :, steps:steps + t_out]

    return pl.pallas_call(
        kernel,
        out_shape=jax.ShapeDtypeStruct((n, c, t_out), x.dtype),
        grid=(n,),
        # C and T equal the full array dims, so the (8,128) divisibility rule
        # is satisfied for any C / T / dtype.
        in_specs=[pl.BlockSpec((1, c, t), lambda i: (i, 0, 0))],
        out_specs=pl.BlockSpec((1, c, t_out), lambda i: (i, 0, 0)),
        compiler_params=pltpu.CompilerParams(dimension_semantics=("parallel",)),
        cost_estimate=pl.CostEstimate(
            flops=0, transcendentals=0,
            bytes_accessed=n * c * (t + t_out) * itemsize),
    )(x)


def skip_forward(x: jax.Array, steps: int, *, max_concurrent_dmas: int = 4) -> jax.Array:
    """Pallas implementation of Skip.forward: x[:, :, steps:].

    `max_concurrent_dmas`: number of in-flight DMAs on the aligned path
    (keep ~2 on v5e, 4-8 on v6e/v7x).
    """
    assert steps >= 0, "steps must be non-negative"
    n, c, t = x.shape
    assert t >= steps, "temporal length must be >= number of skipped steps"
    t_out = t - steps

    if steps == 0:
        return x                                   # identity fast path
    if t_out == 0:
        return jnp.zeros((n, c, 0), dtype=x.dtype)

    itemsize = jnp.dtype(x.dtype).itemsize
    offset_is_aligned = (steps * itemsize) % _FAST_DMA_OFFSET_ALIGN_BYTES == 0
    # Double-buffered in+out blocks of the staged path.
    staged_fits_vmem = 2 * c * (t + t_out) * itemsize <= _STAGED_VMEM_BUDGET_BYTES

    if offset_is_aligned or not staged_fits_vmem:
        # Fast pure-DMA path: no VMEM staging, reads exactly N*C*T_out elements.
        if c % 8 == 0:
            # (N, C, T) -> (N*C, T) is a free re-tiling when C % 8 == 0:
            # fewer descriptor dimensions, longer per-descriptor runs.
            out2d = _skip_dma_2d(x.reshape(n * c, t), steps, t_out, max_concurrent_dmas)
            return out2d.reshape(n, c, t_out)
        return _skip_dma_3d(x, steps, t_out, max_concurrent_dmas)

    # Lane-misaligned offset (common case: small odd `steps`): avoid the
    # element-strided / sub-word-offset HBM->HBM DMA and shift in VMEM instead.
    return _skip_staged(x, steps, t_out)


# TODO(synk): the continual per-step API (_forward_step / get_state / set_state /
# clean_state) is host-side scalar bookkeeping with no tensor compute; only
# forward() is implemented here.


if __name__ == "__main__":
    key = jax.random.PRNGKey(0)
    k1, k2, k3, k4 = jax.random.split(key, 4)

    # Case 1: small odd `steps` (lane-misaligned) -> VMEM-staged kernel.
    steps = 3
    x1 = jax.random.normal(k1, (2, 4, 16), dtype=jnp.float32)
    out1 = jax.block_until_ready(skip_forward(x1, steps))
    assert out1.shape == (2, 4, 16 - steps) and out1.dtype == x1.dtype
    assert jnp.array_equal(out1, x1[:, :, steps:]), "mismatch: staged f32 path"

    # Case 2: 512 B-aligned offset, C % 8 == 0 -> collapsed 2-D multi-DMA path.
    x2 = jax.random.normal(k2, (2, 8, 384), dtype=jnp.float32)
    out2 = jax.block_until_ready(skip_forward(x2, 128))
    assert jnp.array_equal(out2, x2[:, :, 128:]), "mismatch: 2-D DMA path"

    # Case 3: sub-32-bit dtype with odd `steps` -> staged path (no sub-word DMA).
    x3 = jax.random.normal(k3, (2, 4, 20), dtype=jnp.bfloat16)
    out3 = jax.block_until_ready(skip_forward(x3, 5))
    assert jnp.array_equal(out3, x3[:, :, 5:]), "mismatch: staged bf16 path"

    # Case 4: aligned offset, C not a multiple of 8 -> 3-D multi-DMA over N.
    x4 = jax.random.normal(k4, (4, 4, 256), dtype=jnp.float32)
    out4 = jax.block_until_ready(skip_forward(x4, 128))
    assert jnp.array_equal(out4, x4[:, :, 128:]), "mismatch: 3-D DMA path"

    print("KERNEL_OK")
</pallas_src>

<mosaic_0001>
module attributes {stable_mosaic.version = 11 : i64} {
  func.func @kernel(%arg0: i32, %arg1: memref<1x4x16xf32, #tpu.memory_space<vmem>>, %arg2: memref<1x4x13xf32, #tpu.memory_space<vmem>>) attributes {dimension_semantics = [#tpu.dimension_semantics<parallel>], iteration_bounds = array<i64: 2>, scalar_prefetch = 0 : i64, scratch_operands = 0 : i64, tpu.core_type = #tpu.core_type<tc>, window_params = [{transform_indices = @transform_0, window_bounds = array<i64: 1, 4, 16>}, {transform_indices = @transform_1, window_bounds = array<i64: 1, 4, 13>}]} {
    %c0 = arith.constant 0 : index
    %c0_0 = arith.constant 0 : index
    %c0_1 = arith.constant 0 : index
    %0 = vector.load %arg1[%c0, %c0_0, %c0_1] : memref<1x4x16xf32, #tpu.memory_space<vmem>>, vector<1x4x16xf32>
    %1 = vector.extract_strided_slice %0 {offsets = [0, 0, 3], sizes = [1, 4, 13], strides = [1, 1, 1]} : vector<1x4x16xf32> to vector<1x4x13xf32>
    %c0_2 = arith.constant 0 : index
    %c0_3 = arith.constant 0 : index
    %c0_4 = arith.constant 0 : index
    %2 = vector.load %arg2[%c0_2, %c0_3, %c0_4] : memref<1x4x13xf32, #tpu.memory_space<vmem>>, vector<1x4x13xf32>
    tpu.vector_store %arg2[%c0_2, %c0_3, %c0_4], %1 {strides = array<i32>} : memref<1x4x13xf32, #tpu.memory_space<vmem>>, vector<1x4x13xf32>,
    return
  }
  func.func @transform_0(%arg0: i32) -> (i32, i32, i32) {
    %c0_i32 = arith.constant 0 : i32
    %c0_i32_0 = arith.constant 0 : i32
    %c0_i32_1 = arith.constant 0 : i32
    return %arg0, %c0_i32, %c0_i32_0 : i32, i32, i32
  }
  func.func @transform_1(%arg0: i32) -> (i32, i32, i32) {
    %c0_i32 = arith.constant 0 : i32
    %c0_i32_0 = arith.constant 0 : i32
    %c0_i32_1 = arith.constant 0 : i32
    return %arg0, %c0_i32, %c0_i32_0 : i32, i32, i32
  }
}

</mosaic_0001>

<bundles_post_ra>
// kernel: tpu_custom_call.1
= control target key start
LH: loop header
LB: loop body
LE: loop exit
PB: predicated region body
PF: predicated region fallthrough
CT: control target
= control target key end

     0   :  { %6 = vsyncpa [#allocation3], 0  ;;  %s536_s0 = inlined_call_operand.hbm [shape: f32[2,4,16], index: 0, kind: input, shape index: {}]   ;;  %s537_s1 = inlined_call_operand.hbm [shape: f32[2,4,13], index: 1, kind: output, shape index: {}]  }
   0x1   :  { %8 = vsyncpa [#allocation3 + $0x1], 0 }
   0x2   :  { %9 = vsyncpa [#allocation4], 0 }
   0x3   :  { %11 = vsyncpa [#allocation4 + $0x1], 0  ;;  %s389_s6 = smov 0   ;;  %s391_s7 = smov 0  }
   0x4   :  { %s393_s8 = smov 0   ;;  %s395_s9 = smov 0  }
   0x5 LB: > { %s410_s10 = sadd.s32 4294967295, %s374_s9   ;;  %s223_s11 = sadd.s32 4294967294, %s374_s9   ;;  %s374_s9 = sphi %s395_s9, %s554_s9   ;;  %s370_s8 = sphi %s393_s8, %s553_s8   ;;  %s366_s7 = sphi %s391_s7, %s552_s7   ;;  %s362_s6 = sphi %s389_s6, %s551_s6  }
   0x6   : > { %s414_s12 = sadd.s32 1, %s374_s9   ;;  %s24_s13 = sadd.s32 1, %s370_s8 }
   0x7   : > { %s21_s14 = ssub.s32 %s374_s9, %s414_s12  ;;  %p31_p0 = scmp.ne.s32.totalorder %s370_s8, %s366_s7 }
   0x8   : > { %p22_p1 = scmp.eq.s32.totalorder %s21_s14, 0  ;;  %p32_p2 = scmp.eq.s32.totalorder %s374_s9, 0 }
   0x9   : > { %p37_p3 = scmp.ne.s32.totalorder %s366_s7, %s362_s6  ;;  %p38_p4 = scmp.eq.s32.totalorder %s410_s10, 0 }
   0xa   : > { %s426_s15 = scalar_select %p22_p1, %s370_s8, %s24_s13  }
   0xb   : > { %p428_p5 = por %p32_p2, %p31_p0  ;;  %p432_p6 = por %p38_p4, %p37_p3 }
   0xc   : > { %p61_p7 = scmp.eq.s32.totalorder %s410_s10, 1  ;;  %p67_p8 = scmp.eq.s32.totalorder %s223_s11, 1 }
   0xd   : > { %s541_s17 = scalar_select %p432_p6, 1, 0 }
   0xe   : > { %p247_p10 = scmp.lt.s32.totalorder %s374_s9, 2  ;;  %p439_p11 = por %p61_p7, %p31_p0 }
   0xf   : > { %p443_p12 = por %p67_p8, %p37_p3  ;;  %s87_s20 = sand.u32 1, %s370_s8  }
  0x10   : > { %s542_s18 = scalar_select %p439_p11, 1, 0 }
  0x11   : > { %s543_s19 = scalar_select %p443_p12, 1, 0 }
  0x12   : > { %s227_s21 = sshll.u32 %s374_s9, 6  ;;  %s226_s22 = sshll.u32 %s87_s20, 2 }
  0x13   : > { %s452_s25 = scalar_lea.hbm %s536_s0, %s227_s21  ;;  %s91_s26 = scalar_lea.vmem [#allocation2], %s226_s22 }
  0x14   : > { %s98_s27 = sshll.u32 %s91_s26, 4  ;;  %p456_p13 = pnand %p247_p10, %p428_p5  ;;  %s460_s27 = int_to_ptr.vmem [resolvable:$true] %s98_s27 }
  0x15   : > { %s88_s29 = scalar_lea.sflag [#allocation3], %s87_s20  ;;  %s282_s30 = scalar_lea.hbm %s452_s25, 64 }
  0x16   : > { %p283_p2 = scmp.ne.s32.totalorder %s452_s25, %s282_s30  ;;  %p284_p3 = pneg %p456_p13 }
  0x17   : > { %s287_s4 = scalar_lea.hbm %s536_s0, 128  ;;  %p288_p5 = scmp.lt.s32.totalorder %s452_s25, %s536_s0 }
  0x18   : > { %p285_p4 = pnand %p284_p3, %p283_p2  ;;  %p289_p8 = scmp.lt.s32.totalorder %s287_s4, %s282_s30 }
  0x1a   : > { %p286_p7 = pneg %p285_p4  ;;  %p290_p10 = por %p289_p8, %p288_p5 }
  0x1c   : > { %p291_p9 = pnand %p290_p10, %p286_p7 }
  0x1e   : > { %294 = shalt.err (!%p291_p9)
}
  0x1f   : > { %s295_s13 = scalar_lea.vmem %s460_s27, 64  ;;  %s376_s14 = smov [#allocation2]  }
  0x20   : > { %p296_p0 = scmp.ne.s32.totalorder %s460_s27, %s295_s13  ;;  %s300_s16 = sshll.u32 %s376_s14, 4  ;;  %s301_s16 = int_to_ptr.vmem [resolvable:$false] %s300_s16 }
  0x21   : > { %s302_s20 = scalar_lea.vmem %s301_s16, 128  ;;  %p303_p4 = scmp.lt.s32.totalorder %s460_s27, %s301_s16 }
  0x22   : > { %p298_p1 = pnand %p296_p0, %p284_p3  ;;  %p304_p12 = scmp.lt.s32.totalorder %s302_s20, %s295_s13 }
  0x24   : > { %p299_p2 = pneg %p298_p1  ;;  %p305_p11 = por %p304_p12, %p303_p4 }
  0x26   : > { %p306_p6 = pnand %p305_p11, %p299_p2 }
  0x28   : > { %309 = shalt.err (!%p306_p6)
}
  0x29   : > { %242 = dma.hbm_to_vmem [thread:$0]  (!%p456_p13), %s452_s25, 64, %s460_s27, %s88_s29  }
  0x2a   : > { %p545_p9 = scmp.lt.s32.totalorder %s374_s9, 3  ;;  %p546_p7 = scmp.ge.s32.totalorder %s374_s9, 1 }
  0x2c   : > { %p104_p0 = pnand %p546_p7, %p545_p9 }
  0x2d   : > { %s487_s21 = sand.u32 (!%p104_p0), 1, %s366_s7   ;;  %p547_p6 = scmp.ne.s32.totalorder (!%p104_p0), %s541_s17, 0 }
  0x2e   : > { %107 = sbr.rel (%p104_p0) target bundleno = 181 (0xb5), region = 24  ;;  %s229_s22 = sshll.u32 (!%p104_p0), %s487_s21, 2 }
  0x2f   : > { %s110_s23 = scalar_lea.sflag (!%p104_p0), [#allocation3], %s487_s21  ;;  %s113_s24 = scalar_lea.vmem (!%p104_p0), [#allocation2], %s229_s22 }
  0x33   : > { %353 = dma.done.wait (%p547_p6), %s110_s23, 64  }
  0x34   : > { %355 = vsyncadd (%p547_p6), %s110_s23, 4294967232  ;;  %v132_v0 = vld [vmem:[%s113_s24] sm:$0xf]  ;;  %s377_s25 = smov 125   ;;  %s232_s26 = sshll.u32 %s410_s10, 6  ;;  %vm137_vm0 = vcmask 101376  }
  0x35   : > { %134 = vrot.lane.b32.xlu0 %v132_v0, %s377_s25  ;;  %s131_s27 = scalar_lea.vmem [#allocation5], %s229_s22  ;;  %s499_s2 = scalar_lea.hbm %s537_s1, %s232_s26 }
  0x36   : > { %s153_s28 = sshll.u32 %s131_s27, 4  ;;  %s140_s17 = scalar_lea.sflag [#allocation4], %s487_s21  ;;  %s154_s28 = int_to_ptr.vmem [resolvable:$true] %s153_s28 }
  0x37   : > { %s310_s3 = scalar_lea.vmem %s154_s28, 64  ;;  %p548_p12 = scmp.ne.s32.totalorder %s542_s18, 0 }
  0x38   : > { %p311_p11 = scmp.ne.s32.totalorder %s154_s28, %s310_s3  ;;  %s378_s4 = smov [#allocation5]  }
  0x39   : > { %s314_s5 = sshll.u32 %s378_s4, 4  ;;  %s315_s5 = int_to_ptr.vmem [resolvable:$false] %s314_s5 }
  0x3a   : > { %p312_p13 = pnand %p311_p11, %p548_p12  ;;  %s316_s10 = scalar_lea.vmem %s315_s5, 128 }
  0x3b   : > { %p317_p3 = scmp.lt.s32.totalorder %s154_s28, %s315_s5  ;;  %p318_p5 = scmp.lt.s32.totalorder %s316_s10, %s310_s3 }
  0x3c   : > { %p313_p1 = pneg %p312_p13 }
  0x3d   : > { %p319_p8 = por %p318_p5, %p317_p3 }
  0x3f   : > { %p320_p10 = pnand %p319_p8, %p313_p1 }
  0xa7   : > { %v135_v1 = vpop.permute.xlu0 %134 }
  0xa8   : > { %138 = vst.msk [vmem:[%s131_s27] sm:$0xf] %vm137_vm0, %v135_v1 }
  0xa9   : > { %323 = shalt.err (!%p320_p10)
}
  0xaa   : > { %s324_s11 = scalar_lea.hbm %s499_s2, 64  ;;  %s328_s16 = scalar_lea.hbm %s537_s1, 128 }
  0xab   : > { %p325_p2 = scmp.ne.s32.totalorder %s499_s2, %s324_s11  ;;  %p329_p7 = scmp.lt.s32.totalorder %s499_s2, %s537_s1 }
  0xac   : > { %p330_p0 = scmp.lt.s32.totalorder %s328_s16, %s324_s11 }
  0xad   : > { %p326_p4 = pnand %p325_p2, %p548_p12 }
  0xae   : > { %p331_p6 = por %p330_p0, %p329_p7 }
  0xaf   : > { %p327_p9 = pneg %p326_p4 }
  0xb1   : > { %p332_p11 = pnand %p331_p6, %p327_p9 }
  0xb3   : > { %335 = shalt.err (!%p332_p11)
}
  0xb4   : > { %237 = dma.vmem_to_hbm [thread:$0]  (%p548_p12), %s154_s28, 64, %s499_s2, %s140_s17  }
  0xb5 PF: > { %s165_s22 = sand.u32 1, %s362_s6   ;;  %p549_p13 = scmp.ne.s32.totalorder %s543_s19, 0 }
  0xb6   : > { %p550_p1 = scmp.ge.s32.totalorder %s374_s9, 2  ;;  %s166_s23 = scalar_lea.sflag [#allocation4], %s165_s22 }
  0xb8   : > { %p244_p3 = pnand %p550_p1, %p549_p13 }
  0xba   : > { %p245_p5 = pneg %p244_p3 }
  0xbc   : > { %357 = dma.done.wait (%p245_p5), %s166_s23, 64  }
  0xbd   : > { %359 = vsyncadd (%p245_p5), %s166_s23, 4294967232  ;;  %p14_p8 = scmp.ge.s32.totalorder %s414_s12, 4   ;;  %s551_s6 = smov %s366_s7 }
  0xbe   : > { %s552_s7 = smov %s370_s8  ;;  %s553_s8 = smov %s426_s15 }
  0xbf   : > { %s554_s9 = smov %s414_s12  ;;  %16 = sbr.rel (!%p14_p8) target bundleno = 5 (0x5), region = 69 }
  0xc4   :  { %171 = vsyncpa [#allocation3], 1 }
  0xc5   :  { %173 = vsyncpa [#allocation3 + $0x1], 1 }
  0xc6   :  { %174 = vsyncpa [#allocation4], 1 }
  0xc7   :  { %176 = vsyncpa [#allocation4 + $0x1], 1 }

</bundles_post_ra>
